<compile_context>
chip_gen: v6e
topology: v6e:2x2x1
jax: 0.10.0
libtpu: 0.0.40
codegen_flags: <defaults>
</compile_context>

<pallas_src>
import functools

import jax
import jax.numpy as jnp
from jax.experimental import pallas as pl
from jax.experimental.pallas import tpu as pltpu

LOG_STD_MIN = -20.0
LOG_STD_MAX = 2.0
LANES = 128          # TPU lane width; hidden and 2*num_actions must fit in it.
MAX_BATCH_TILE = 512 # batch tile size once B grows past one tile.


def _round_up(x, m):
    return (x + m - 1) // m * m


# --------------------------------------------------------------------------- #
# Kernel
# --------------------------------------------------------------------------- #
def policy_forward_kernel(x_ref, w_ref, b_ref, out_ref, *, r1, num_actions):
    """Fused MLP: relu(relu(x@W1+b1)@W2+b2) @ [Wm|Ws] + [bm|bs], clamp log_std.

    Weight slab layout (all rows are 128 lanes, zero padded):
      rows [0, r1)              : W1      (real block [:num_inputs, :hidden])
      rows [r1, r1+128)         : W2      (real block [:hidden,     :hidden])
      rows [r1+128, r1+256)     : W_heads = [Wm | Ws] (real [:hidden, :2A])
    Bias slab (8, 128): row 0 = b1, row 1 = b2, row 2 = [bm | bs].
    """
    x = x_ref[...]                                     # (TB, r1) f32

    w1 = w_ref[0:r1, :]                                # (r1, 128)
    w2 = w_ref[r1:r1 + LANES, :]                       # (128, 128)
    wh = w_ref[r1 + LANES:r1 + 2 * LANES, :]           # (128, 128)

    b1 = b_ref[0:1, :]                                 # (1, 128)
    b2 = b_ref[1:2, :]
    bh = b_ref[2:3, :]

    # x = relu(linear1(state)); zero-padded lanes stay exactly 0.
    h1 = jnp.maximum(
        jnp.dot(x, w1, preferred_element_type=jnp.float32) + b1, 0.0)
    # x = relu(linear2(x))
    h2 = jnp.maximum(
        jnp.dot(h1, w2, preferred_element_type=jnp.float32) + b2, 0.0)
    # Fused heads: lanes [0, A) = mean, lanes [A, 2A) = log_std, rest = 0.
    y = jnp.dot(h2, wh, preferred_element_type=jnp.float32) + bh  # (TB, 128)

    # Clamp only the log_std lanes (pure VPU: iota + 2 cmp + clip + select).
    lane = jax.lax.broadcasted_iota(jnp.int32, y.shape, dimension=1)
    is_log_std = (lane >= num_actions) & (lane < 2 * num_actions)
    y = jnp.where(is_log_std, jnp.clip(y, LOG_STD_MIN, LOG_STD_MAX), y)

    out_ref[...] = y.astype(out_ref.dtype)             # single full-lane store


# --------------------------------------------------------------------------- #
# Host-side parameter packing (done once, outside the per-call path)
# --------------------------------------------------------------------------- #
def pack_params(params, num_inputs, num_actions, hidden_size):
    """Pack the 8 (in,out)-layout params into 2 lane-dense f32 slabs."""
    assert hidden_size <= LANES and 2 * num_actions <= LANES
    w1, b1, w2, b2, wm, bm, ws, bs = params
    r1 = _round_up(num_inputs, 8)

    w_slab = jnp.zeros((r1 + 2 * LANES, LANES), jnp.float32)
    w_slab = w_slab.at[0:num_inputs, 0:hidden_size].set(w1)
    w_slab = w_slab.at[r1:r1 + hidden_size, 0:hidden_size].set(w2)
    off = r1 + LANES
    w_slab = w_slab.at[off:off + hidden_size, 0:num_actions].set(wm)
    w_slab = w_slab.at[off:off + hidden_size,
                       num_actions:2 * num_actions].set(ws)

    b_slab = jnp.zeros((8, LANES), jnp.float32)
    b_slab = b_slab.at[0, 0:hidden_size].set(b1[0])
    b_slab = b_slab.at[1, 0:hidden_size].set(b2[0])
    b_slab = b_slab.at[2, 0:num_actions].set(bm[0])
    b_slab = b_slab.at[2, num_actions:2 * num_actions].set(bs[0])
    return w_slab, b_slab, r1


# --------------------------------------------------------------------------- #
# Wrapper
# --------------------------------------------------------------------------- #
def policy_forward(state, packed, num_actions):
    """(mean, log_std) = PolicyNetwork.forward(state) via one Pallas kernel."""
    w_slab, b_slab, r1 = packed
    B, F = state.shape

    # Pad batch to a full sublane-aligned tile and features to the slab rows.
    TB = min(MAX_BATCH_TILE, _round_up(B, 8))
    B_pad = _round_up(B, TB)
    if (B_pad, r1) != (B, F):
        x = jnp.zeros((B_pad, r1), state.dtype).at[:B, :F].set(state)
    else:
        x = state

    kernel = functools.partial(
        policy_forward_kernel, r1=r1, num_actions=num_actions)

    out = pl.pallas_call(
        kernel,
        out_shape=jax.ShapeDtypeStruct((B_pad, LANES), jnp.float32),
        grid=(B_pad // TB,),
        in_specs=[
            pl.BlockSpec((TB, r1), lambda i: (i, 0)),          # state tile
            pl.BlockSpec(w_slab.shape, lambda i: (0, 0)),      # weights: pinned
            pl.BlockSpec(b_slab.shape, lambda i: (0, 0)),      # biases:  pinned
        ],
        out_specs=pl.BlockSpec((TB, LANES), lambda i: (i, 0)),
        compiler_params=pltpu.CompilerParams(
            dimension_semantics=("parallel",)),
    )(x, w_slab, b_slab)

    mean = out[:B, :num_actions]
    log_std = out[:B, num_actions:2 * num_actions]
    return mean, log_std


# --------------------------------------------------------------------------- #
# Init (mirrors the PyTorch module) + pure-JAX reference
# --------------------------------------------------------------------------- #
def init_params(key, num_inputs, num_actions, hidden_size, init_w=0.003):
    """Weights stored as (in, out) = transpose of PyTorch's (out, in)."""
    ks = jax.random.split(key, 8)

    def uni(k, shape, bound):
        return jax.random.uniform(k, shape, jnp.float32, -bound, bound)

    b1_bound = 1.0 / jnp.sqrt(num_inputs)
    b2_bound = 1.0 / jnp.sqrt(hidden_size)
    w1 = uni(ks[0], (num_inputs, hidden_size), b1_bound)
    b1 = uni(ks[1], (1, hidden_size), b1_bound)
    w2 = uni(ks[2], (hidden_size, hidden_size), b2_bound)
    b2 = uni(ks[3], (1, hidden_size), b2_bound)
    wm = uni(ks[4], (hidden_size, num_actions), init_w)
    bm = uni(ks[5], (1, num_actions), init_w)
    ws = uni(ks[6], (hidden_size, num_actions), init_w)
    bs = uni(ks[7], (1, num_actions), init_w)
    return (w1, b1, w2, b2, wm, bm, ws, bs)


def reference_forward(state, params):
    w1, b1, w2, b2, wm, bm, ws, bs = params
    h1 = jnp.maximum(state @ w1 + b1, 0.0)
    h2 = jnp.maximum(h1 @ w2 + b2, 0.0)
    mean = h2 @ wm + bm
    log_std = jnp.clip(h2 @ ws + bs, LOG_STD_MIN, LOG_STD_MAX)
    return mean, log_std


# TODO(synk): model-saving (os.mkdir / torch.save) and the Normal-sampling
# helpers (evaluate / get_action) are host-side utilities outside the forward
# pass and are not expressed as kernels.

if __name__ == "__main__":
    num_inputs = 16
    num_actions = 8
    hidden_size = 32

    key = jax.random.PRNGKey(0)
    k_state, k_params, k_big = jax.random.split(key, 3)

    params = init_params(k_params, num_inputs, num_actions, hidden_size)
    packed = pack_params(params, num_inputs, num_actions, hidden_size)

    # Small batch (single grid step, padded tile).
    state = jax.random.normal(k_state, (4, num_inputs), jnp.float32)
    mean, log_std = policy_forward(state, packed, num_actions)
    jax.block_until_ready((mean, log_std))
    mean_ref, log_std_ref = reference_forward(state, params)
    assert jnp.allclose(mean, mean_ref, atol=1e-5, rtol=1e-5)
    assert jnp.allclose(log_std, log_std_ref, atol=1e-5, rtol=1e-5)

    # Larger, tile-misaligned batch exercising the multi-step grid path.
    state_big = jax.random.normal(k_big, (1040, num_inputs), jnp.float32)
    mean_b, log_std_b = policy_forward(state_big, packed, num_actions)
    jax.block_until_ready((mean_b, log_std_b))
    mean_bref, log_std_bref = reference_forward(state_big, params)
    assert jnp.allclose(mean_b, mean_bref, atol=1e-5, rtol=1e-5)
    assert jnp.allclose(log_std_b, log_std_bref, atol=1e-5, rtol=1e-5)

    print("KERNEL_OK")
</pallas_src>

<mosaic_0001>
module attributes {stable_mosaic.version = 11 : i64} {
  func.func @policy_forward_kernel(%arg0: i32, %arg1: memref<8x16xf32, #tpu.memory_space<vmem>>, %arg2: memref<272x128xf32, #tpu.memory_space<vmem>>, %arg3: memref<8x128xf32, #tpu.memory_space<vmem>>, %arg4: memref<8x128xf32, #tpu.memory_space<vmem>>) attributes {dimension_semantics = [#tpu.dimension_semantics<parallel>], iteration_bounds = array<i64: 1>, scalar_prefetch = 0 : i64, scratch_operands = 0 : i64, tpu.core_type = #tpu.core_type<tc>, window_params = [{transform_indices = @transform_0, window_bounds = array<i64: 8, 16>}, {pipeline_mode = #tpu.pipeline_mode<synchronous>, transform_indices = @transform_1, window_bounds = array<i64: 272, 128>}, {pipeline_mode = #tpu.pipeline_mode<synchronous>, transform_indices = @transform_2, window_bounds = array<i64: 8, 128>}, {transform_indices = @transform_3, window_bounds = array<i64: 8, 128>}]} {
    %c0 = arith.constant 0 : index
    %c0_0 = arith.constant 0 : index
    %0 = vector.load %arg1[%c0, %c0_0] : memref<8x16xf32, #tpu.memory_space<vmem>>, vector<8x16xf32>
    %c0_1 = arith.constant 0 : index
    %c0_2 = arith.constant 0 : index
    %1 = vector.load %arg2[%c0_1, %c0_2] : memref<272x128xf32, #tpu.memory_space<vmem>>, vector<16x128xf32>
    %c16 = arith.constant 16 : index
    %c0_3 = arith.constant 0 : index
    %2 = vector.load %arg2[%c16, %c0_3] : memref<272x128xf32, #tpu.memory_space<vmem>>, vector<128x128xf32>
    %c144 = arith.constant 144 : index
    %c0_4 = arith.constant 0 : index
    %3 = vector.load %arg2[%c144, %c0_4] : memref<272x128xf32, #tpu.memory_space<vmem>>, vector<128x128xf32>
    %c0_5 = arith.constant 0 : index
    %c0_6 = arith.constant 0 : index
    %4 = vector.load %arg3[%c0_5, %c0_6] : memref<8x128xf32, #tpu.memory_space<vmem>>, vector<1x128xf32>
    %c1 = arith.constant 1 : index
    %c0_7 = arith.constant 0 : index
    %5 = vector.load %arg3[%c1, %c0_7] : memref<8x128xf32, #tpu.memory_space<vmem>>, vector<1x128xf32>
    %c2 = arith.constant 2 : index
    %c0_8 = arith.constant 0 : index
    %6 = vector.load %arg3[%c2, %c0_8] : memref<8x128xf32, #tpu.memory_space<vmem>>, vector<1x128xf32>
    %cst = arith.constant dense<0.000000e+00> : vector<8x128xf32>
    %7 = tpu.matmul %0, %1, %cst {dimension_numbers = #tpu.dot_dimension_numbers<[1], [0], [0], [1], [0, 0, 1, 1], [], []>} : vector<8x16xf32>, vector<16x128xf32>, vector<8x128xf32> -> vector<8x128xf32>
    %8 = vector.broadcast %4 : vector<1x128xf32> to vector<8x128xf32>
    %9 = arith.addf %7, %8 : vector<8x128xf32>
    %cst_9 = arith.constant 0.000000e+00 : f32
    %10 = vector.broadcast %cst_9 : f32 to vector<8x128xf32>
    %11 = arith.maximumf %9, %10 : vector<8x128xf32>
    %cst_10 = arith.constant dense<0.000000e+00> : vector<8x128xf32>
    %12 = tpu.matmul %11, %2, %cst_10 {dimension_numbers = #tpu.dot_dimension_numbers<[1], [0], [0], [1], [0, 0, 1, 1], [], []>} : vector<8x128xf32>, vector<128x128xf32>, vector<8x128xf32> -> vector<8x128xf32>
    %13 = vector.broadcast %5 : vector<1x128xf32> to vector<8x128xf32>
    %14 = arith.addf %12, %13 : vector<8x128xf32>
    %cst_11 = arith.constant 0.000000e+00 : f32
    %15 = vector.broadcast %cst_11 : f32 to vector<8x128xf32>
    %16 = arith.maximumf %14, %15 : vector<8x128xf32>
    %cst_12 = arith.constant dense<0.000000e+00> : vector<8x128xf32>
    %17 = tpu.matmul %16, %3, %cst_12 {dimension_numbers = #tpu.dot_dimension_numbers<[1], [0], [0], [1], [0, 0, 1, 1], [], []>} : vector<8x128xf32>, vector<128x128xf32>, vector<8x128xf32> -> vector<8x128xf32>
    %18 = vector.broadcast %6 : vector<1x128xf32> to vector<8x128xf32>
    %19 = arith.addf %17, %18 : vector<8x128xf32>
    %20 = tpu.iota {dimensions = array<i32: 1>} : vector<8x128xi32>
    %c8_i32 = arith.constant 8 : i32
    %21 = vector.broadcast %c8_i32 : i32 to vector<8x128xi32>
    %22 = arith.cmpi sge, %20, %21 : vector<8x128xi32>
    %c16_i32 = arith.constant 16 : i32
    %23 = vector.broadcast %c16_i32 : i32 to vector<8x128xi32>
    %24 = arith.cmpi slt, %20, %23 : vector<8x128xi32>
    %25 = arith.andi %22, %24 : vector<8x128xi1>
    %cst_13 = arith.constant -2.000000e+01 : f32
    %cst_14 = arith.constant 2.000000e+00 : f32
    %26 = vector.broadcast %cst_13 : f32 to vector<8x128xf32>
    %27 = arith.maximumf %26, %19 : vector<8x128xf32>
    %28 = vector.broadcast %cst_14 : f32 to vector<8x128xf32>
    %29 = arith.minimumf %28, %27 : vector<8x128xf32>
    %30 = arith.select %25, %29, %19 : vector<8x128xi1>, vector<8x128xf32>
    %c0_15 = arith.constant 0 : index
    %c0_16 = arith.constant 0 : index
    %31 = vector.load %arg4[%c0_15, %c0_16] : memref<8x128xf32, #tpu.memory_space<vmem>>, vector<8x128xf32>
    tpu.vector_store %arg4[%c0_15, %c0_16], %30 {strides = array<i32>} : memref<8x128xf32, #tpu.memory_space<vmem>>, vector<8x128xf32>,
    return
  }
  func.func @transform_0(%arg0: i32) -> (i32, i32) {
    %c0_i32 = arith.constant 0 : i32
    %c0_i32_0 = arith.constant 0 : i32
    return %arg0, %c0_i32 : i32, i32
  }
  func.func @transform_1(%arg0: i32) -> (i32, i32) {
    %c0_i32 = arith.constant 0 : i32
    %c0_i32_0 = arith.constant 0 : i32
    %c0_i32_1 = arith.constant 0 : i32
    return %c0_i32, %c0_i32_0 : i32, i32
  }
  func.func @transform_2(%arg0: i32) -> (i32, i32) {
    %c0_i32 = arith.constant 0 : i32
    %c0_i32_0 = arith.constant 0 : i32
    %c0_i32_1 = arith.constant 0 : i32
    return %c0_i32, %c0_i32_0 : i32, i32
  }
  func.func @transform_3(%arg0: i32) -> (i32, i32) {
    %c0_i32 = arith.constant 0 : i32
    %c0_i32_0 = arith.constant 0 : i32
    return %arg0, %c0_i32 : i32, i32
  }
}

</mosaic_0001>

<bundles_post_ra>
// kernel: tpu_custom_call.1
= control target key start
LH: loop header
LB: loop body
LE: loop exit
PB: predicated region body
PF: predicated region fallthrough
CT: control target
= control target key end

     0   :  { %8 = vsyncpa [#allocation3], 0  ;;  %s635_s0 = inlined_call_operand.hbm [shape: f32[8,16], index: 0, kind: input, shape index: {}]   ;;  %s636_s1 = inlined_call_operand.hbm [shape: f32[272,128], index: 1, kind: input, shape index: {}]   ;;  %s637_s2 = inlined_call_operand.hbm [shape: f32[8,128], index: 2, kind: input, shape index: {}]   ;;  %s638_s3 = inlined_call_operand.hbm [shape: f32[8,128], index: 3, kind: output, shape index: {}]  }
   0x1   :  { %9 = vsyncpa [#allocation6], 0 }
   0x2   :  { %10 = vsyncpa [#allocation4], 0  ;;  %s555_s12 = smov [#allocation5]  }
   0x3   :  { %s26_s13 = sshll.u32 %s555_s12, 4  ;;  %s27_s13 = int_to_ptr.vmem [resolvable:$true] %s26_s13 }
   0x4   :  { %s477_s14 = scalar_lea.vmem %s27_s13, 4352  ;;  %p482_p1 = scmp.lt.s32.totalorder %s27_s13, %s27_s13 }
   0x5   :  { %p478_p0 = scmp.ne.s32.totalorder %s27_s13, %s477_s14  ;;  %p483_p2 = scmp.lt.s32.totalorder %s477_s14, %s477_s14 }
   0x7   :  { %p484_p3 = por %p483_p2, %p482_p1 }
   0x9   :  { %p485_p4 = pnand %p484_p3, %p478_p0 }
   0xb   :  { %488 = shalt.err (!%p485_p4)
}
   0xc   :  { %s556_s15 = smov 128   ;;  %s557_s16 = smov 8  }
   0xd   :  { %32 = dma.hbm_to_vmem [thread:$0]  %s636_s1, 4352, %s27_s13, [#allocation6], %s556_s15, %s556_s15, %s557_s16  }
   0xe   :  { %s558_s19 = smov [#allocation2]   ;;  %s559_s21 = smov [#allocation7]  }
   0xf   :  { %s17_s20 = sshll.u32 %s558_s19, 4  ;;  %s39_s22 = sshll.u32 %s559_s21, 4  ;;  %s18_s20 = int_to_ptr.vmem [resolvable:$true] %s17_s20  ;;  %s40_s22 = int_to_ptr.vmem [resolvable:$true] %s39_s22 }
  0x10   :  { %s497_s23 = scalar_lea.vmem %s18_s20, 128  ;;  %p502_p6 = scmp.lt.s32.totalorder %s18_s20, %s18_s20 }
  0x11   :  { %p498_p5 = scmp.ne.s32.totalorder %s18_s20, %s497_s23  ;;  %p503_p7 = scmp.lt.s32.totalorder %s497_s23, %s497_s23 }
  0x13   :  { %p504_p8 = por %p503_p7, %p502_p6 }
  0x15   :  { %p505_p9 = pnand %p504_p8, %p498_p5 }
  0x17   :  { %508 = shalt.err (!%p505_p9)
}
  0x18   :  { %20 = dma.hbm_to_vmem [thread:$0]  %s635_s0, 128, %s18_s20, [#allocation3]  }
  0x19   :  { %s517_s26 = scalar_lea.vmem %s40_s22, 128  ;;  %p522_p11 = scmp.lt.s32.totalorder %s40_s22, %s40_s22 }
  0x1a   :  { %p518_p10 = scmp.ne.s32.totalorder %s40_s22, %s517_s26  ;;  %p523_p12 = scmp.lt.s32.totalorder %s517_s26, %s517_s26 }
  0x1c   :  { %p524_p13 = por %p523_p12, %p522_p11 }
  0x1e   :  { %p525_p0 = pnand %p524_p13, %p518_p10 }
  0x20   :  { %528 = shalt.err (!%p525_p0)
}
  0x21   :  { %42 = dma.hbm_to_vmem [thread:$0]  %s637_s2, 128, %s40_s22, [#allocation6]  }
  0x22   :  { %549 = dma.done.wait [#allocation3], 128  }
  0x23   :  { %550 = vsyncadd [#allocation3], 4294967168 }
  0x24   :  { %551 = dma.done.wait [#allocation6], 4480  }
  0x25   :  { %552 = vsyncadd [#allocation6], 4294962816  ;;  %v560_v0 = vmov 0.0   ;;  %vm561_vm0 = vmmov 0   ;;  %v54_v1 = vld [vmem:[#allocation5 + $0x8] sm:$0xff]  ;;  %v53_v2 = vld [vmem:[#allocation5] sm:$0xff]  ;;  %v318_v46 = vlaneseq }
  0x26   :  { %384 = vmatprep.subr.mxu0 %v560_v0  ;;  %388 = vmatprep.mubr.msk.f32.mxu0 %vm561_vm0, %v560_v0  ;;  %v52_v3 = vld [vmem:[#allocation2] sm:$0xff]  ;;  %vm94_vm1 = vcmask 130048   ;;  %v70_v4 = vld [vmem:[#allocation5 + $0x88] sm:$0xff]  ;;  %v69_v5 = vld [vmem:[#allocation5 + $0x80] sm:$0xff]  ;;  %s562_s0 = smov [#allocation8]  }
  0x27   :  { %391 = vmatprep.subr.mxu1 %v560_v0  ;;  %423 = vmatprep.mubr.msk.f32.mxu1 %vm561_vm0, %v560_v0  ;;  %v68_v6 = vld [vmem:[#allocation5 + $0x78] sm:$0xff]  ;;  %v67_v7 = vld [vmem:[#allocation5 + $0x70] sm:$0xff]  ;;  %v66_v8 = vld [vmem:[#allocation5 + $0x68] sm:$0xff]  ;;  %v319_v47 = vand.u32 127, %v318_v46  ;;  %s333_s2 = sshll.u32 %s562_s0, 4  ;;  %s334_s2 = int_to_ptr.vmem [resolvable:$true] %s333_s2 }
  0x28   :  { %385 = vmatpush3.msra.mxu0 %v54_v1  ;;  %392 = vmatpush3.msra.mxu1 %v70_v4  ;;  %v65_v9 = vld [vmem:[#allocation5 + $0x60] sm:$0xff]  ;;  %v64_v10 = vld [vmem:[#allocation5 + $0x58] sm:$0xff]  ;;  %v63_v11 = vld [vmem:[#allocation5 + $0x50] sm:$0xff]  ;;  %s529_s28 = scalar_lea.vmem %s334_s2, 128  ;;  %p534_p2 = scmp.lt.s32.totalorder %s334_s2, %s334_s2 }
  0x29   :  { %386 = vmatprep.subr.mxu0 %v560_v0  ;;  %393 = vmatprep.subr.mxu1 %v560_v0  ;;  %v62_v12 = vld [vmem:[#allocation5 + $0x48] sm:$0xff]  ;;  %v61_v13 = vld [vmem:[#allocation5 + $0x40] sm:$0xff]  ;;  %v60_v14 = vld [vmem:[#allocation5 + $0x38] sm:$0xff]  ;;  %vm320_vm2 = vcmp.ge.s32.totalorder %v319_v47, 8  ;;  %vm321_vm3 = vcmp.lt.s32.totalorder %v319_v47, 16  ;;  %p530_p1 = scmp.ne.s32.totalorder %s334_s2, %s529_s28  ;;  %p535_p3 = scmp.lt.s32.totalorder %s529_s28, %s529_s28 }
  0x2a   :  { %387 = vmatpush3.msra.mxu0 %v53_v2  ;;  %394 = vmatpush3.msra.mxu1 %v69_v5  ;;  %v59_v15 = vld [vmem:[#allocation5 + $0x30] sm:$0xff]  ;;  %v58_v16 = vld [vmem:[#allocation5 + $0x28] sm:$0xff]  ;;  %v57_v17 = vld [vmem:[#allocation5 + $0x20] sm:$0xff] }
  0x2b   :  { %389 = vmatmul.mubr.msk.f32.vlgmr.msra.gmra.mxu0 %vm94_vm1, %v52_v3  ;;  %395 = vmatprep.subr.mxu1 %v560_v0  ;;  %v56_v18 = vld [vmem:[#allocation5 + $0x18] sm:$0xff]  ;;  %v55_v19 = vld [vmem:[#allocation5 + $0x10] sm:$0xff]  ;;  %v86_v20 = vld [vmem:[#allocation5 + $0x108] sm:$0xff]  ;;  %p536_p4 = por %p535_p3, %p534_p2 }
  0x2c   :  { %426 = vmatprep.subr.mxu0 %v560_v0  ;;  %396 = vmatpush3.msra.mxu1 %v68_v6  ;;  %v85_v21 = vld [vmem:[#allocation5 + $0x100] sm:$0xff]  ;;  %v84_v22 = vld [vmem:[#allocation5 + $0xf8] sm:$0xff]  ;;  %v83_v23 = vld [vmem:[#allocation5 + $0xf0] sm:$0xff] }
  0x2d   :  { %458 = vmatprep.mubr.msk.f32.mxu0 %vm561_vm0, %v560_v0  ;;  %397 = vmatprep.subr.mxu1 %v560_v0  ;;  %v82_v24 = vld [vmem:[#allocation5 + $0xe8] sm:$0xff]  ;;  %v81_v25 = vld [vmem:[#allocation5 + $0xe0] sm:$0xff]  ;;  %v80_v26 = vld [vmem:[#allocation5 + $0xd8] sm:$0xff]  ;;  %p537_p5 = pnand %p536_p4, %p530_p1 }
  0x2e   :  { %398 = vmatpush3.msra.mxu1 %v67_v7  ;;  %427 = vmatpush3.msra.mxu0 %v86_v20  ;;  %v79_v27 = vld [vmem:[#allocation5 + $0xd0] sm:$0xff]  ;;  %v78_v28 = vld [vmem:[#allocation5 + $0xc8] sm:$0xff]  ;;  %v77_v29 = vld [vmem:[#allocation5 + $0xc0] sm:$0xff] }
  0x2f   :  { %399 = vmatprep.subr.mxu1 %v560_v0  ;;  %428 = vmatprep.subr.mxu0 %v560_v0  ;;  %v76_v30 = vld [vmem:[#allocation5 + $0xb8] sm:$0xff]  ;;  %v75_v31 = vld [vmem:[#allocation5 + $0xb0] sm:$0xff]  ;;  %v74_v32 = vld [vmem:[#allocation5 + $0xa8] sm:$0xff] }
  0x30   :  { %400 = vmatpush3.msra.mxu1 %v66_v8  ;;  %429 = vmatpush3.msra.mxu0 %v85_v21  ;;  %v343_v33 = vld [vmem:[#allocation7] ss:$0 sm:$0xff]  ;;  %v73_v38 = vld [vmem:[#allocation5 + $0xa0] sm:$0xff]  ;;  %v72_v39 = vld [vmem:[#allocation5 + $0x98] sm:$0xff] }
  0x31   :  { %401 = vmatprep.subr.mxu1 %v560_v0  ;;  %430 = vmatprep.subr.mxu0 %v560_v0  ;;  %v71_v40 = vld [vmem:[#allocation5 + $0x90] sm:$0xff]  ;;  %vm322_vm4 = vmand %vm320_vm2, %vm321_vm3 }
  0x32   :  { %402 = vmatpush3.msra.mxu1 %v65_v9  ;;  %431 = vmatpush3.msra.mxu0 %v84_v22  ;;  %v345_v41 = vld [vmem:[#allocation7 + $0x1] ss:$0 sm:$0xff]  ;;  %v346_v48 = vld [vmem:[#allocation7 + $0x2] ss:$0 sm:$0xff] }
  0x33   :  { %403 = vmatprep.subr.mxu1 %v560_v0  ;;  %432 = vmatprep.subr.mxu0 %v560_v0 }
  0x34   :  { %404 = vmatpush3.msra.mxu1 %v64_v10  ;;  %433 = vmatpush3.msra.mxu0 %v83_v23 }
  0x35   :  { %405 = vmatprep.subr.mxu1 %v560_v0  ;;  %434 = vmatprep.subr.mxu0 %v560_v0 }
  0x36   :  { %406 = vmatpush3.msra.mxu1 %v63_v11  ;;  %435 = vmatpush3.msra.mxu0 %v82_v24 }
  0x37   :  { %407 = vmatprep.subr.mxu1 %v560_v0  ;;  %436 = vmatprep.subr.mxu0 %v560_v0 }
  0x38   :  { %408 = vmatpush3.msra.mxu1 %v62_v12  ;;  %437 = vmatpush3.msra.mxu0 %v81_v25 }
  0x39   :  { %409 = vmatprep.subr.mxu1 %v560_v0  ;;  %438 = vmatprep.subr.mxu0 %v560_v0 }
  0x3a   :  { %410 = vmatpush3.msra.mxu1 %v61_v13  ;;  %439 = vmatpush3.msra.mxu0 %v80_v26 }
  0x3b   :  { %411 = vmatprep.subr.mxu1 %v560_v0  ;;  %440 = vmatprep.subr.mxu0 %v560_v0 }
  0x3c   :  { %412 = vmatpush3.msra.mxu1 %v60_v14  ;;  %441 = vmatpush3.msra.mxu0 %v79_v27 }
  0x3d   :  { %413 = vmatprep.subr.mxu1 %v560_v0  ;;  %442 = vmatprep.subr.mxu0 %v560_v0 }
  0x3e   :  { %414 = vmatpush3.msra.mxu1 %v59_v15  ;;  %443 = vmatpush3.msra.mxu0 %v78_v28 }
  0x3f   :  { %415 = vmatprep.subr.mxu1 %v560_v0  ;;  %444 = vmatprep.subr.mxu0 %v560_v0 }
  0x40   :  { %416 = vmatpush3.msra.mxu1 %v58_v16  ;;  %445 = vmatpush3.msra.mxu0 %v77_v29 }
  0x41   :  { %417 = vmatprep.subr.mxu1 %v560_v0  ;;  %446 = vmatprep.subr.mxu0 %v560_v0 }
  0x42   :  { %418 = vmatpush3.msra.mxu1 %v57_v17  ;;  %447 = vmatpush3.msra.mxu0 %v76_v30 }
  0x43   :  { %419 = vmatprep.subr.mxu1 %v560_v0  ;;  %448 = vmatprep.subr.mxu0 %v560_v0 }
  0x44   :  { %420 = vmatpush3.msra.mxu1 %v56_v18  ;;  %449 = vmatpush3.msra.mxu0 %v75_v31 }
  0x45   :  { %421 = vmatprep.subr.mxu1 %v560_v0  ;;  %450 = vmatprep.subr.mxu0 %v560_v0 }
  0x46   :  { %422 = vmatpush3.msra.mxu1 %v55_v19  ;;  %451 = vmatpush3.msra.mxu0 %v74_v32 }
  0x47   :  { %452 = vmatprep.subr.mxu0 %v560_v0 }
  0x48   :  { %453 = vmatpush3.msra.mxu0 %v73_v38 }
  0x49   :  { %454 = vmatprep.subr.mxu0 %v560_v0 }
  0x4a   :  { %455 = vmatpush3.msra.mxu0 %v72_v39 }
  0x4b   :  { %456 = vmatprep.subr.mxu0 %v560_v0 }
  0x4c   :  { %457 = vmatpush3.msra.mxu0 %v71_v40 }
  0xeb   :  { %v164_v34 = vpop.f32.mrf.mxu0 }
  0xec   :  { %v165_v35 = vadd.f32 %v343_v33, %v164_v34 }
  0xed   :  { %v390_v36 = vpop.f32.mrf.mxu0 }
  0xee   :  { %v168_v37 = vmax.f32 %v165_v35, 0.0 }
  0xf0   :  { %424 = vmatmul.mubr.f32.vlgmr.msra.gmra.mxu1 %v168_v37 }
 0x1b0   :  { %v239_v42 = vpop.f32.mrf.mxu1 }
 0x1b1   :  { %v240_v43 = vadd.f32 %v345_v41, %v239_v42 }
 0x1b2   :  { %v425_v44 = vpop.f32.mrf.mxu1 }
 0x1b3   :  { %v243_v45 = vmax.f32 %v240_v43, 0.0 }
 0x1b5   :  { %459 = vmatmul.mubr.f32.vlgmr.msra.gmra.mxu0 %v243_v45 }
 0x275   :  { %v314_v49 = vpop.f32.mrf.mxu0 }
 0x276   :  { %v315_v50 = vadd.f32 %v346_v48, %v314_v49 }
 0x277   :  { %v460_v51 = vpop.f32.mrf.mxu0 }
 0x278   :  { %v323_v52 = vmax.f32 %v315_v50, -20.0 }
 0x27a   :  { %v324_v53 = vmin.f32 %v323_v52, 2.0 }
 0x27c   :  { %v325_v54 = vsel %vm322_vm4, %v324_v53, %v315_v50 }
 0x27d   :  { %326 = vst [vmem:[#allocation8] sm:$0xff] %v325_v54 }
 0x27e   :  { %540 = shalt.err (!%p537_p5)
}
 0x27f   :  { %336 = dma.vmem_to_hbm [thread:$0]  %s334_s2, 128, %s638_s3, [#allocation4]  }
 0x280   :  { %553 = dma.done.wait [#allocation4], 128  }
 0x281   :  { %554 = vsyncadd [#allocation4], 4294967168 }
 0x282   :  { %340 = vsyncpa [#allocation3], 1 }
 0x283   :  { %341 = vsyncpa [#allocation6], 1 }
 0x284   :  { %342 = vsyncpa [#allocation4], 1 }

</bundles_post_ra>
